<compile_context>
chip_gen: v7x
topology: tpu7x:2x2x1
jax: 0.10.0
libtpu: 0.0.40
codegen_flags: <defaults>
</compile_context>

<pallas_src>
import functools

import jax
import jax.numpy as jnp
from jax import lax
from jax.experimental import pallas as pl
from jax.experimental.pallas import tpu as pltpu


def _round_up(x, m):
    return (x + m - 1) // m * m


def _vmem_capacity_bytes():
    """Physical VMEM of the local TPU generation (conservative fallback)."""
    try:
        return int(pltpu.get_tpu_info().vmem_capacity_bytes)
    except Exception:
        return 64 << 20  # assume the smallest generation (v7x)


def _pick_tb(b_pad):
    """Batch tile: multiple of 16, <= 256, divides b_pad, >= 2 steps if possible."""
    tb = min(256, b_pad)
    while b_pad % tb:
        tb -= 16
    if b_pad // tb < 2 and tb > 16:
        # v7x has two TensorCores: make the "parallel" batch axis splittable.
        half = tb // 2
        if half % 16 == 0 and b_pad % half == 0:
            tb = half
        else:
            for cand in range(tb - 16, 15, -16):
                if b_pad % cand == 0:
                    tb = cand
                    break
    return tb


def _plan_kernel_a(b_pad, d_pad, f, c_pad, vmem_cap):
    """Tile plan + VMEM request for the backbone/head kernel."""
    small_vmem = vmem_cap <= (64 << 20)               # v7x-class part
    hard_cap = (40 << 20) if small_vmem else (56 << 20)
    budget = hard_cap - (2 << 20)

    tb = _pick_tb(b_pad)

    # Keep the backbone weight resident (single reduction step) when it fits
    # comfortably in VMEM; otherwise tile the reduction axis.
    wb_budget = (8 << 20) if small_vmem else (16 << 20)
    if d_pad * f * 2 <= wb_budget:
        tk = d_pad
    else:
        tk = next((t for t in (512, 256, 128)
                   if t <= d_pad and d_pad % t == 0), d_pad)

    def est(tb_, tk_):
        return (2 * tb_ * tk_ * 4          # x tile (f32), double-buffered
                + 2 * tk_ * f * 2          # backbone weight tile (bf16)
                + 2 * f * c_pad * 2        # fused head weight (bf16)
                + 2 * tb_ * c_pad * 4      # output slab tile (f32)
                + tb_ * f * 4)             # f32 feature accumulator scratch

    while est(tb, tk) > budget and tk > 128:
        tk = next((t for t in (2048, 1024, 512, 256, 128)
                   if t < tk and d_pad % t == 0), 128)
    while est(tb, tk) > budget and tb > 16:
        nb = tb - 16
        while nb > 16 and b_pad % nb:
            nb -= 16
        tb = nb
    # TODO(synk): an F grid axis would be needed to bound VMEM for extremely
    # large feature_size; realistic GodinNet heads always fit the plan above.

    vmem_limit = int(min(hard_cap, max(4 << 20, est(tb, tk) + (4 << 20))))
    return tb, tk, vmem_limit


# ---------------------------------------------------------------------------
# Kernel A: backbone Linear + ReLU (tiled over D) fused with the h/g head.
# ---------------------------------------------------------------------------
def _backbone_head_kernel(x_ref, wb_ref, waug_ref, slab_ref, acc_ref, *,
                          num_classes):
    k = pl.program_id(1)

    @pl.when(k == 0)
    def _():
        acc_ref[...] = jnp.zeros_like(acc_ref)

    # x streamed as f32, VPU-cast to bf16 per tile; f32 MXU accumulation.
    acc_ref[...] += jnp.dot(x_ref[...].astype(jnp.bfloat16), wb_ref[...],
                            preferred_element_type=jnp.float32)

    @pl.when(k == pl.num_programs(1) - 1)
    def _():
        feat = jnp.maximum(acc_ref[...], 0.0)                      # ReLU, f32
        # Fused (cosine numerators | g_lin) matmul: [TB, F] x [F, Cpad].
        raw = jnp.dot(feat.astype(jnp.bfloat16), waug_ref[...],
                      preferred_element_type=jnp.float32)
        # Exact reciprocal of the feature norm (matches torch `norm`, eps 1e-4).
        inv_fnorm = 1.0 / (jnp.sqrt(jnp.sum(feat * feat, axis=1,
                                            keepdims=True)) + 1e-4)
        col = lax.broadcasted_iota(jnp.int32, raw.shape, 1)
        scale = jnp.where(col < num_classes, inv_fnorm, 1.0)
        slab_ref[...] = raw * scale


# ---------------------------------------------------------------------------
# Kernel B1: BatchNorm1d(1) batch statistics over the g column (masked).
# ---------------------------------------------------------------------------
def _g_stats_kernel(gblk_ref, bg_ref, gamma_ref, beta_ref, stats_ref,
                    sum_ref, sq_ref, *, valid_b, col_off, tile_b):
    i = pl.program_id(0)

    @pl.when(i == 0)
    def _():
        sum_ref[...] = jnp.zeros_like(sum_ref)
        sq_ref[...] = jnp.zeros_like(sq_ref)

    blk = gblk_ref[...]                                            # [TB, 128]
    row = i * tile_b + lax.broadcasted_iota(jnp.int32, blk.shape, 0)
    col = lax.broadcasted_iota(jnp.int32, blk.shape, 1)
    valid = (row < valid_b) & (col == col_off)
    g = jnp.where(valid, blk + bg_ref[0, 0], 0.0)
    sum_ref[...] += jnp.sum(g, axis=0, keepdims=True)
    sq_ref[...] += jnp.sum(g * g, axis=0, keepdims=True)

    @pl.when(i == pl.num_programs(0) - 1)
    def _():
        total = jnp.sum(sum_ref[...], axis=1, keepdims=True)       # [1, 1]
        totsq = jnp.sum(sq_ref[...], axis=1, keepdims=True)
        mean = total / valid_b
        var = totsq / valid_b - mean * mean    # biased var (BN training mode)
        scale = gamma_ref[0, 0] * lax.rsqrt(var + 1e-5)
        shift = beta_ref[0, 0] - mean * scale
        lane = lax.broadcasted_iota(jnp.int32, stats_ref.shape, 1)
        stats_ref[...] = (jnp.where(lane == 0, scale, 0.0)
                          + jnp.where(lane == 1, shift, 0.0))


# ---------------------------------------------------------------------------
# Kernel B2a: training path, quot = numerators / sigmoid(g_bn), batch-tiled.
# ---------------------------------------------------------------------------
def _quotient_kernel(slab_ref, bg_ref, scale_ref, shift_ref, quot_ref, *,
                     num_classes):
    slab = slab_ref[...]                                           # [TB, Cpad]
    g_lin = slab[:, num_classes:num_classes + 1] + bg_ref[0, 0]    # [TB, 1]
    g_bn = g_lin * scale_ref[0, 0] + shift_ref[0, 0]
    # numerators / sigmoid(g_bn) == numerators * (1 + exp(-g_bn)), exactly.
    quot_ref[...] = slab * (1.0 + jnp.exp(-g_bn))


# ---------------------------------------------------------------------------
# Kernel B2b: inference 'g' path, sigmoid(g_bn) only (no quotient slab).
# ---------------------------------------------------------------------------
def _denominator_kernel(gblk_ref, bg_ref, scale_ref, shift_ref, den_ref, *,
                        col_off):
    g_lin = gblk_ref[:, col_off:col_off + 1] + bg_ref[0, 0]        # [TB, 1]
    g_bn = g_lin * scale_ref[0, 0] + shift_ref[0, 0]
    den = 1.0 / (1.0 + jnp.exp(-g_bn))                             # exact sigmoid
    den_ref[...] = jnp.broadcast_to(den, den_ref.shape)


# ---------------------------------------------------------------------------
# One-time parameter prep (hoisted out of the forward).
# ---------------------------------------------------------------------------
def prepare_godin_params(params):
    """Cosine-weight normalization, fused [F, Cpad] head slab, bf16 casts and
    D padding. Call once and reuse across forward calls."""
    wb, wh, wg = params["wb"], params["wh"], params["wg"]
    d, f = wb.shape
    c = wh.shape[0]
    d_pad = _round_up(d, 128)
    c_pad = _round_up(c + 1, 128)

    wb_p = wb if d_pad == d else jnp.pad(wb, ((0, d_pad - d), (0, 0)))
    wn = wh / (jnp.sqrt(jnp.sum(wh * wh, axis=1, keepdims=True)) + 1e-4)
    waug = jnp.zeros((f, c_pad), jnp.float32)
    waug = waug.at[:, :c].set(wn.T)
    waug = waug.at[:, c].set(wg.reshape(f))

    return dict(
        wb_bf=wb_p.astype(jnp.bfloat16),
        waug_bf=waug.astype(jnp.bfloat16),
        bg=params["bg"].reshape(1, 1).astype(jnp.float32),
        gamma=params["gamma"].reshape(1, 1).astype(jnp.float32),
        beta=params["beta"].reshape(1, 1).astype(jnp.float32),
        D=d, D_pad=d_pad, F=f, C=c, Cpad=c_pad,
    )


# ---------------------------------------------------------------------------
# Forward
# ---------------------------------------------------------------------------
def godin_forward(x_nchw, prep, inference=False, score_func='h'):
    """GodinNet.forward on a prepared parameter dict (prepare_godin_params)."""
    if inference and score_func not in ('h', 'g'):
        print('Invalid score function, using h instead')
        score_func = 'h'

    b = x_nchw.shape[0]
    d, d_pad, f, c, c_pad = (prep["D"], prep["D_pad"], prep["F"],
                             prep["C"], prep["Cpad"])
    x_flat = x_nchw.reshape(b, -1).astype(jnp.float32)
    assert x_flat.shape[1] == d

    b_pad = _round_up(b, 16)                 # bf16 packs two rows per sublane
    vmem_cap = _vmem_capacity_bytes()
    tb, tk, vmem_limit = _plan_kernel_a(b_pad, d_pad, f, c_pad, vmem_cap)

    if (b_pad, d_pad) != (b, d):
        x_flat = jnp.pad(x_flat, ((0, b_pad - b), (0, d_pad - d)))

    grid = (b_pad // tb, d_pad // tk)
    cost = pl.CostEstimate(
        flops=2 * b_pad * d_pad * f + 2 * b_pad * f * c_pad,
        transcendentals=2 * b_pad,
        bytes_accessed=(b_pad * d_pad * 4 + d_pad * f * 2 + f * c_pad * 2
                        + b_pad * c_pad * 4),
    )

    # Kernel A: lane-dense [B_pad, Cpad] slab (cols 0..C-1 = cosine
    # numerators already divided by the feature norm, col C = raw g_lin).
    slab = pl.pallas_call(
        functools.partial(_backbone_head_kernel, num_classes=c),
        out_shape=jax.ShapeDtypeStruct((b_pad, c_pad), jnp.float32),
        grid_spec=pltpu.PrefetchScalarGridSpec(
            num_scalar_prefetch=0,
            grid=grid,
            in_specs=[
                pl.BlockSpec((tb, tk), lambda i, k: (i, k)),      # x tile
                pl.BlockSpec((tk, f), lambda i, k: (k, 0)),       # backbone W
                pl.BlockSpec((f, c_pad), lambda i, k: (0, 0)),    # fused head W
            ],
            out_specs=pl.BlockSpec((tb, c_pad), lambda i, k: (i, 0)),
            scratch_shapes=[pltpu.VMEM((tb, f), jnp.float32)],
        ),
        compiler_params=pltpu.CompilerParams(
            dimension_semantics=("parallel", "arbitrary"),
            vmem_limit_bytes=vmem_limit,
        ),
        cost_estimate=cost,
    )(x_flat, prep["wb_bf"], prep["waug_bf"])

    if inference and score_func == 'h':
        return slab[:b, :c]                   # numerators

    # Kernel B1: BatchNorm1d(1) batch statistics over the g column.
    # TODO(synk): eval-mode BatchNorm (running_mean/running_var) is not wired;
    # this matches the PyTorch module in train() mode (batch statistics).
    g_blk = c // 128                          # lane block holding column C
    g_off = c % 128
    stats = pl.pallas_call(
        functools.partial(_g_stats_kernel, valid_b=b, col_off=g_off, tile_b=tb),
        out_shape=jax.ShapeDtypeStruct((1, 128), jnp.float32),
        grid_spec=pltpu.PrefetchScalarGridSpec(
            num_scalar_prefetch=0,
            grid=(b_pad // tb,),
            in_specs=[
                pl.BlockSpec((tb, 128), lambda i: (i, g_blk)),
                pl.BlockSpec(memory_space=pltpu.MemorySpace.SMEM),
                pl.BlockSpec(memory_space=pltpu.MemorySpace.SMEM),
                pl.BlockSpec(memory_space=pltpu.MemorySpace.SMEM),
            ],
            out_specs=pl.BlockSpec((1, 128), lambda i: (0, 0)),
            scratch_shapes=[pltpu.VMEM((1, 128), jnp.float32),
                            pltpu.VMEM((1, 128), jnp.float32)],
        ),
        compiler_params=pltpu.CompilerParams(
            dimension_semantics=("arbitrary",)),
    )(slab, prep["bg"], prep["gamma"], prep["beta"])
    bn_scale = stats[0:1, 0:1]                # gamma / sqrt(var + eps)
    bn_shift = stats[0:1, 1:2]                # beta - mean * scale

    if inference:                             # score_func == 'g'
        den = pl.pallas_call(
            functools.partial(_denominator_kernel, col_off=g_off),
            out_shape=jax.ShapeDtypeStruct((b_pad, 128), jnp.float32),
            grid_spec=pltpu.PrefetchScalarGridSpec(
                num_scalar_prefetch=0,
                grid=(b_pad // tb,),
                in_specs=[
                    pl.BlockSpec((tb, 128), lambda i: (i, g_blk)),
                    pl.BlockSpec(memory_space=pltpu.MemorySpace.SMEM),
                    pl.BlockSpec(memory_space=pltpu.MemorySpace.SMEM),
                    pl.BlockSpec(memory_space=pltpu.MemorySpace.SMEM),
                ],
                out_specs=pl.BlockSpec((tb, 128), lambda i: (i, 0)),
            ),
            compiler_params=pltpu.CompilerParams(
                dimension_semantics=("parallel",)),
        )(slab, prep["bg"], bn_scale, bn_shift)
        return den[:b, :1]                    # denominators

    # Training path: batch-tiled quotient kernel.
    quot = pl.pallas_call(
        functools.partial(_quotient_kernel, num_classes=c),
        out_shape=jax.ShapeDtypeStruct((b_pad, c_pad), jnp.float32),
        grid_spec=pltpu.PrefetchScalarGridSpec(
            num_scalar_prefetch=0,
            grid=(b_pad // tb,),
            in_specs=[
                pl.BlockSpec((tb, c_pad), lambda i: (i, 0)),
                pl.BlockSpec(memory_space=pltpu.MemorySpace.SMEM),
                pl.BlockSpec(memory_space=pltpu.MemorySpace.SMEM),
                pl.BlockSpec(memory_space=pltpu.MemorySpace.SMEM),
            ],
            out_specs=pl.BlockSpec((tb, c_pad), lambda i: (i, 0)),
        ),
        compiler_params=pltpu.CompilerParams(
            dimension_semantics=("parallel",)),
    )(slab, prep["bg"], bn_scale, bn_shift)
    return quot[:b, :c]


def init_params(key, in_dim, feature_size, num_classes):
    kb, kh, kg, kgb = jax.random.split(key, 4)
    # TODO(synk): the real backbone is dependency-injected; a flatten+Linear+ReLU
    # stand-in (deterministically initialized) is used here.
    wb = jax.random.normal(kb, (in_dim, feature_size), jnp.float32) * jnp.sqrt(
        2.0 / in_dim)
    # CosineDeconf h weight: kaiming_normal_(fan_in, relu) -> std = sqrt(2/F)
    wh = jax.random.normal(kh, (num_classes, feature_size),
                           jnp.float32) * jnp.sqrt(2.0 / feature_size)
    # g Linear(F, 1): PyTorch default init ~ U(-1/sqrt(F), 1/sqrt(F))
    bound = 1.0 / jnp.sqrt(feature_size)
    wg = jax.random.uniform(kg, (1, feature_size), jnp.float32, -bound, bound)
    bg = jax.random.uniform(kgb, (1, 1), jnp.float32, -bound, bound)
    gamma = jnp.ones((1, 1), jnp.float32)     # BatchNorm1d(1) weight
    beta = jnp.zeros((1, 1), jnp.float32)     # BatchNorm1d(1) bias
    return dict(wb=wb, wh=wh, wg=wg, bg=bg, gamma=gamma, beta=beta)


if __name__ == "__main__":
    key = jax.random.PRNGKey(0)
    kx, kp = jax.random.split(key)

    B, Cin, H, W = 2, 4, 16, 16
    feature_size, num_classes = 32, 8
    in_dim = Cin * H * W

    x = jax.random.normal(kx, (B, Cin, H, W), jnp.float32)
    params = init_params(kp, in_dim, feature_size, num_classes)
    prep = prepare_godin_params(params)       # one-time (hoisted) weight prep

    quot = godin_forward(x, prep)                                   # training
    num = godin_forward(x, prep, inference=True, score_func='h')
    den = godin_forward(x, prep, inference=True, score_func='g')
    jax.block_until_ready((quot, num, den))

    assert quot.shape == (B, num_classes)
    assert num.shape == (B, num_classes)
    assert den.shape == (B, 1)
    assert bool(jnp.all(jnp.isfinite(quot)))
    assert bool(jnp.all(jnp.isfinite(num)))
    assert bool(jnp.all(jnp.isfinite(den)))
    print("KERNEL_OK")
</pallas_src>

<mosaic_0001>
module attributes {stable_mosaic.version = 11 : i64} {
  func.func @_backbone_head_kernel(%arg0: i32, %arg1: i32, %arg2: memref<16x1024xf32, #tpu.memory_space<vmem>>, %arg3: memref<1024x32xbf16, #tpu.memory_space<vmem>>, %arg4: memref<32x128xbf16, #tpu.memory_space<vmem>>, %arg5: memref<16x128xf32, #tpu.memory_space<vmem>>, %arg6: memref<16x32xf32, #tpu.memory_space<vmem>>) attributes {dimension_semantics = [#tpu.dimension_semantics<parallel>, #tpu.dimension_semantics<arbitrary>], iteration_bounds = array<i64: 1, 1>, scalar_prefetch = 0 : i64, scratch_operands = 1 : i64, tpu.core_type = #tpu.core_type<tc>, window_params = [{transform_indices = @transform_0, window_bounds = array<i64: 16, 1024>}, {transform_indices = @transform_1, window_bounds = array<i64: 1024, 32>}, {pipeline_mode = #tpu.pipeline_mode<synchronous>, transform_indices = @transform_2, window_bounds = array<i64: 32, 128>}, {transform_indices = @transform_3, window_bounds = array<i64: 16, 128>}]} {
    %c0_i32 = arith.constant 0 : i32
    %0 = arith.cmpi eq, %arg1, %c0_i32 : i32
    %1 = arith.extui %0 : i1 to i32
    %c0_i32_0 = arith.constant 0 : i32
    %2 = arith.cmpi ne, %1, %c0_i32_0 : i32
    scf.if %2 {
      %cst_10 = arith.constant 0.000000e+00 : f32
      %13 = vector.broadcast %cst_10 : f32 to vector<16x32xf32>
      %c0_11 = arith.constant 0 : index
      %c0_12 = arith.constant 0 : index
      %14 = vector.load %arg6[%c0_11, %c0_12] : memref<16x32xf32, #tpu.memory_space<vmem>>, vector<16x32xf32>
      tpu.vector_store %arg6[%c0_11, %c0_12], %13 {strides = array<i32>} : memref<16x32xf32, #tpu.memory_space<vmem>>, vector<16x32xf32>,
    } else {
    }
    %c0 = arith.constant 0 : index
    %c0_1 = arith.constant 0 : index
    %3 = vector.load %arg6[%c0, %c0_1] : memref<16x32xf32, #tpu.memory_space<vmem>>, vector<16x32xf32>
    %c0_2 = arith.constant 0 : index
    %c0_3 = arith.constant 0 : index
    %4 = vector.load %arg2[%c0_2, %c0_3] : memref<16x1024xf32, #tpu.memory_space<vmem>>, vector<16x1024xf32>
    %5 = arith.truncf %4 : vector<16x1024xf32> to vector<16x1024xbf16>
    %c0_4 = arith.constant 0 : index
    %c0_5 = arith.constant 0 : index
    %6 = vector.load %arg3[%c0_4, %c0_5] : memref<1024x32xbf16, #tpu.memory_space<vmem>>, vector<1024x32xbf16>
    %cst = arith.constant dense<0.000000e+00> : vector<16x32xf32>
    %7 = tpu.matmul %5, %6, %cst {dimension_numbers = #tpu.dot_dimension_numbers<[1], [0], [0], [1], [0, 0, 1, 1], [], []>} : vector<16x1024xbf16>, vector<1024x32xbf16>, vector<16x32xf32> -> vector<16x32xf32>
    %8 = arith.addf %3, %7 : vector<16x32xf32>
    %c0_6 = arith.constant 0 : index
    %c0_7 = arith.constant 0 : index
    %9 = vector.load %arg6[%c0_6, %c0_7] : memref<16x32xf32, #tpu.memory_space<vmem>>, vector<16x32xf32>
    tpu.vector_store %arg6[%c0_6, %c0_7], %8 {strides = array<i32>} : memref<16x32xf32, #tpu.memory_space<vmem>>, vector<16x32xf32>,
    %c0_i32_8 = arith.constant 0 : i32
    %10 = arith.cmpi eq, %arg1, %c0_i32_8 : i32
    %11 = arith.extui %10 : i1 to i32
    %c0_i32_9 = arith.constant 0 : i32
    %12 = arith.cmpi ne, %11, %c0_i32_9 : i32
    scf.if %12 {
      %c0_10 = arith.constant 0 : index
      %c0_11 = arith.constant 0 : index
      %13 = vector.load %arg6[%c0_10, %c0_11] : memref<16x32xf32, #tpu.memory_space<vmem>>, vector<16x32xf32>
      %cst_12 = arith.constant 0.000000e+00 : f32
      %14 = vector.broadcast %cst_12 : f32 to vector<16x32xf32>
      %15 = arith.maximumf %13, %14 : vector<16x32xf32>
      %16 = arith.truncf %15 : vector<16x32xf32> to vector<16x32xbf16>
      %c0_13 = arith.constant 0 : index
      %c0_14 = arith.constant 0 : index
      %17 = vector.load %arg4[%c0_13, %c0_14] : memref<32x128xbf16, #tpu.memory_space<vmem>>, vector<32x128xbf16>
      %cst_15 = arith.constant dense<0.000000e+00> : vector<16x128xf32>
      %18 = tpu.matmul %16, %17, %cst_15 {dimension_numbers = #tpu.dot_dimension_numbers<[1], [0], [0], [1], [0, 0, 1, 1], [], []>} : vector<16x32xbf16>, vector<32x128xbf16>, vector<16x128xf32> -> vector<16x128xf32>
      %19 = arith.mulf %15, %15 : vector<16x32xf32>
      %cst_16 = arith.constant dense<0.000000e+00> : vector<16xf32>
      %20 = vector.multi_reduction <add>, %19, %cst_16 [1] : vector<16x32xf32> to vector<16xf32>
      %21 = vector.shape_cast %20 : vector<16xf32> to vector<16x1xf32>
      %22 = math.sqrt %21 : vector<16x1xf32>
      %cst_17 = arith.constant 9.99999974E-5 : f32
      %23 = vector.broadcast %cst_17 : f32 to vector<16x1xf32>
      %24 = arith.addf %22, %23 : vector<16x1xf32>
      %cst_18 = arith.constant 1.000000e+00 : f32
      %25 = vector.broadcast %cst_18 : f32 to vector<16x1xf32>
      %26 = arith.divf %25, %24 : vector<16x1xf32>
      %27 = tpu.iota {dimensions = array<i32: 1>} : vector<16x128xi32>
      %c8_i32 = arith.constant 8 : i32
      %28 = vector.broadcast %c8_i32 : i32 to vector<16x128xi32>
      %29 = arith.cmpi slt, %27, %28 : vector<16x128xi32>
      %cst_19 = arith.constant 1.000000e+00 : f32
      %30 = vector.shape_cast %26 : vector<16x1xf32> to vector<16x1xf32>
      %31 = vector.broadcast %30 : vector<16x1xf32> to vector<16x128xf32>
      %32 = vector.broadcast %cst_19 : f32 to vector<16x128xf32>
      %33 = arith.select %29, %31, %32 : vector<16x128xi1>, vector<16x128xf32>
      %34 = arith.mulf %18, %33 : vector<16x128xf32>
      %c0_20 = arith.constant 0 : index
      %c0_21 = arith.constant 0 : index
      %35 = vector.load %arg5[%c0_20, %c0_21] : memref<16x128xf32, #tpu.memory_space<vmem>>, vector<16x128xf32>
      tpu.vector_store %arg5[%c0_20, %c0_21], %34 {strides = array<i32>} : memref<16x128xf32, #tpu.memory_space<vmem>>, vector<16x128xf32>,
    } else {
    }
    return
  }
  func.func @transform_0(%arg0: i32, %arg1: i32) -> (i32, i32) {
    %c0_i32 = arith.constant 0 : i32
    return %arg0, %arg1 : i32, i32
  }
  func.func @transform_1(%arg0: i32, %arg1: i32) -> (i32, i32) {
    %c0_i32 = arith.constant 0 : i32
    %c0_i32_0 = arith.constant 0 : i32
    return %arg1, %c0_i32 : i32, i32
  }
  func.func @transform_2(%arg0: i32, %arg1: i32) -> (i32, i32) {
    %c0_i32 = arith.constant 0 : i32
    %c0_i32_0 = arith.constant 0 : i32
    %c0_i32_1 = arith.constant 0 : i32
    return %c0_i32, %c0_i32_0 : i32, i32
  }
  func.func @transform_3(%arg0: i32, %arg1: i32) -> (i32, i32) {
    %c0_i32 = arith.constant 0 : i32
    %c0_i32_0 = arith.constant 0 : i32
    return %arg0, %c0_i32 : i32, i32
  }
}

</mosaic_0001>

<bundles_post_ra>
// kernel: tpu_custom_call.1
= control target key start
LH: loop header
LB: loop body
LE: loop exit
PB: predicated region body
PF: predicated region fallthrough
CT: control target
= control target key end

     0   :  { %s1410_s0 = inlined_call_operand.vmem [shape: f32[16,1024], index: 0, kind: input, shape index: {}]   ;;  %s1411_s1 = inlined_call_operand.vmem [shape: bf16[1024,32], index: 1, kind: input, shape index: {}]   ;;  %s1412_s2 = inlined_call_operand.vmem [shape: bf16[32,128], index: 2, kind: input, shape index: {}]   ;;  %s1413_s3 = inlined_call_operand.hbm [shape: f32[16,128], index: 3, kind: output, shape index: {}]  }
   0x1   :  { %v1022_v0 = vld [vmem:[%s1411_s1 + $0x40] sm:$0xff]   ;;  %v1026_v4 = vld [vmem:[%s1411_s1 + $0x48] sm:$0xff]   ;;  %v1030_v8 = vld [vmem:[%s1411_s1 + $0x50] sm:$0xff]  }
   0x2   :  { %v1023_v1 = vld [vmem:[%s1411_s1 + $0xc0] sm:$0xff]   ;;  %918 = vmatprep.subr.bf16.mxu0 %v1022_v0  ;;  %v1027_v5 = vld [vmem:[%s1411_s1 + $0xc8] sm:$0xff]   ;;  %v1031_v9 = vld [vmem:[%s1411_s1 + $0xd0] sm:$0xff]  }
   0x3   :  { %v1024_v2 = vld [vmem:[%s1411_s1] sm:$0xff]   ;;  %940 = vmatprep.subr.bf16.mxu1 %v1023_v1  ;;  %v1028_v6 = vld [vmem:[%s1411_s1 + $0x8] sm:$0xff]   ;;  %v1032_v10 = vld [vmem:[%s1411_s1 + $0x10] sm:$0xff]  }
   0x4   :  { %v1025_v3 = vld [vmem:[%s1411_s1 + $0x80] sm:$0xff]   ;;  %919 = vmatpush3.bf16.msra.mxu0 %v1024_v2  ;;  %v1029_v7 = vld [vmem:[%s1411_s1 + $0x88] sm:$0xff]   ;;  %v1033_v11 = vld [vmem:[%s1411_s1 + $0x90] sm:$0xff]  }
   0x5   :  { %941 = vmatpush3.bf16.msra.mxu1 %v1025_v3  ;;  %920 = vmatprep.subr.bf16.mxu0 %v1026_v4  ;;  %v1034_v12 = vld [vmem:[%s1411_s1 + $0x58] sm:$0xff]   ;;  %v1038_v16 = vld [vmem:[%s1411_s1 + $0x60] sm:$0xff]   ;;  %v1042_v20 = vld [vmem:[%s1411_s1 + $0x68] sm:$0xff]  }
   0x6   :  { %942 = vmatprep.subr.bf16.mxu1 %v1027_v5  ;;  %v1035_v13 = vld [vmem:[%s1411_s1 + $0xd8] sm:$0xff]   ;;  %v1039_v17 = vld [vmem:[%s1411_s1 + $0xe0] sm:$0xff]   ;;  %v1043_v21 = vld [vmem:[%s1411_s1 + $0xe8] sm:$0xff]  }
   0x7   :  { %v1036_v14 = vld [vmem:[%s1411_s1 + $0x18] sm:$0xff]   ;;  %v1040_v18 = vld [vmem:[%s1411_s1 + $0x20] sm:$0xff]   ;;  %v1044_v22 = vld [vmem:[%s1411_s1 + $0x28] sm:$0xff]  }
   0x8   :  { %921 = vmatpush3.bf16.msra.mxu0 %v1028_v6  ;;  %v1037_v15 = vld [vmem:[%s1411_s1 + $0x98] sm:$0xff]   ;;  %v1041_v19 = vld [vmem:[%s1411_s1 + $0xa0] sm:$0xff]   ;;  %v1045_v23 = vld [vmem:[%s1411_s1 + $0xa8] sm:$0xff]  }
   0x9   :  { %943 = vmatpush3.bf16.msra.mxu1 %v1029_v7  ;;  %922 = vmatprep.subr.bf16.mxu0 %v1030_v8  ;;  %v1046_v24 = vld [vmem:[%s1411_s1 + $0x70] sm:$0xff]   ;;  %v1050_v28 = vld [vmem:[%s1411_s1 + $0x78] sm:$0xff]   ;;  %v26_v32 = vld [vmem:[%s1410_s0 + $0x8] sm:$0xff] }
   0xa   :  { %944 = vmatprep.subr.bf16.mxu1 %v1031_v9  ;;  %v1047_v25 = vld [vmem:[%s1411_s1 + $0xf0] sm:$0xff]   ;;  %v1051_v29 = vld [vmem:[%s1411_s1 + $0xf8] sm:$0xff]   ;;  %v34_v33 = vld [vmem:[%s1410_s0 + $0x48] sm:$0xff] }
   0xb   :  { %v1048_v26 = vld [vmem:[%s1411_s1 + $0x30] sm:$0xff]   ;;  %v1052_v30 = vld [vmem:[%s1411_s1 + $0x38] sm:$0xff]   ;;  %v42_v35 = vpack.c.bf16 %v34_v33, %v26_v32  ;;  %v25_v37 = vld [vmem:[%s1410_s0] sm:$0xff] }
   0xc   :  { %923 = vmatpush3.bf16.msra.mxu0 %v1032_v10  ;;  %v1049_v27 = vld [vmem:[%s1411_s1 + $0xb0] sm:$0xff]   ;;  %v1053_v31 = vld [vmem:[%s1411_s1 + $0xb8] sm:$0xff]   ;;  %v33_v38 = vld [vmem:[%s1410_s0 + $0x40] sm:$0xff] }
   0xd   :  { %945 = vmatpush3.bf16.msra.mxu1 %v1033_v11  ;;  %924 = vmatprep.subr.bf16.mxu0 %v1034_v12  ;;  %v28_v34 = vld [vmem:[%s1410_s0 + $0x18] sm:$0xff]  ;;  %v41_v40 = vpack.c.bf16 %v33_v38, %v25_v37  ;;  %v27_v41 = vld [vmem:[%s1410_s0 + $0x10] sm:$0xff]  ;;  %v1054_v44 = vld [vmem:[%s1411_s1 + $0x140] sm:$0xff]  }
   0xe   :  { %946 = vmatprep.subr.bf16.mxu1 %v1035_v13  ;;  %v36_v36 = vld [vmem:[%s1410_s0 + $0x58] sm:$0xff]  ;;  %v35_v42 = vld [vmem:[%s1410_s0 + $0x50] sm:$0xff]  ;;  %593 = vmatprep.mubr.bf16.mxu0 %v42_v35  ;;  %v1055_v45 = vld [vmem:[%s1411_s1 + $0x1c0] sm:$0xff]  }
   0xf   :  { %v44_v39 = vpack.c.bf16 %v36_v36, %v28_v34  ;;  %v43_v43 = vpack.c.bf16 %v35_v42, %v27_v41  ;;  %v1056_v46 = vld [vmem:[%s1411_s1 + $0x100] sm:$0xff]   ;;  %v1058_v48 = vld [vmem:[%s1411_s1 + $0x148] sm:$0xff]   ;;  %v1062_v52 = vld [vmem:[%s1411_s1 + $0x150] sm:$0xff]  }
  0x10   :  { %925 = vmatpush3.bf16.msra.mxu0 %v1036_v14  ;;  %v1057_v47 = vld [vmem:[%s1411_s1 + $0x180] sm:$0xff]   ;;  %v1059_v49 = vld [vmem:[%s1411_s1 + $0x1c8] sm:$0xff]   ;;  %v1063_v53 = vld [vmem:[%s1411_s1 + $0x1d0] sm:$0xff]  }
  0x11   :  { %947 = vmatpush3.bf16.msra.mxu1 %v1037_v15  ;;  %926 = vmatprep.subr.bf16.mxu0 %v1038_v16  ;;  %v1060_v50 = vld [vmem:[%s1411_s1 + $0x108] sm:$0xff]   ;;  %v1064_v54 = vld [vmem:[%s1411_s1 + $0x110] sm:$0xff]   ;;  %v1066_v56 = vld [vmem:[%s1411_s1 + $0x158] sm:$0xff]  }
  0x12   :  { %948 = vmatprep.subr.bf16.mxu1 %v1039_v17  ;;  %634 = vmatprep.mubr.bf16.mxu1 %v44_v39  ;;  %v1061_v51 = vld [vmem:[%s1411_s1 + $0x188] sm:$0xff]   ;;  %v1065_v55 = vld [vmem:[%s1411_s1 + $0x190] sm:$0xff]   ;;  %v1067_v57 = vld [vmem:[%s1411_s1 + $0x1d8] sm:$0xff]  }
  0x13   :  { %v1068_v58 = vld [vmem:[%s1411_s1 + $0x118] sm:$0xff]   ;;  %v1070_v60 = vld [vmem:[%s1411_s1 + $0x160] sm:$0xff]   ;;  %v1074_v0 = vld [vmem:[%s1411_s1 + $0x168] sm:$0xff]  }
  0x14   :  { %927 = vmatpush3.bf16.msra.mxu0 %v1040_v18  ;;  %v1069_v59 = vld [vmem:[%s1411_s1 + $0x198] sm:$0xff]   ;;  %v1071_v61 = vld [vmem:[%s1411_s1 + $0x1e0] sm:$0xff]   ;;  %v1075_v1 = vld [vmem:[%s1411_s1 + $0x1e8] sm:$0xff]  }
  0x15   :  { %949 = vmatpush3.bf16.msra.mxu1 %v1041_v19  ;;  %928 = vmatprep.subr.bf16.mxu0 %v1042_v20  ;;  %v1072_v62 = vld [vmem:[%s1411_s1 + $0x120] sm:$0xff]   ;;  %v1076_v2 = vld [vmem:[%s1411_s1 + $0x128] sm:$0xff]   ;;  %v1078_v4 = vld [vmem:[%s1411_s1 + $0x170] sm:$0xff]  }
  0x16   :  { %950 = vmatprep.subr.bf16.mxu1 %v1043_v21  ;;  %v1073_v63 = vld [vmem:[%s1411_s1 + $0x1a0] sm:$0xff]   ;;  %v1077_v3 = vld [vmem:[%s1411_s1 + $0x1a8] sm:$0xff]   ;;  %v1079_v5 = vld [vmem:[%s1411_s1 + $0x1f0] sm:$0xff]  }
  0x17   :  { %v1080_v6 = vld [vmem:[%s1411_s1 + $0x130] sm:$0xff]   ;;  %v1082_v8 = vld [vmem:[%s1411_s1 + $0x178] sm:$0xff]   ;;  %v30_v12 = vld [vmem:[%s1410_s0 + $0x28] sm:$0xff] }
  0x18   :  { %929 = vmatpush3.bf16.msra.mxu0 %v1044_v22  ;;  %v1081_v7 = vld [vmem:[%s1411_s1 + $0x1b0] sm:$0xff]   ;;  %v1083_v9 = vld [vmem:[%s1411_s1 + $0x1f8] sm:$0xff]   ;;  %v38_v13 = vld [vmem:[%s1410_s0 + $0x68] sm:$0xff] }
  0x19   :  { %951 = vmatpush3.bf16.msra.mxu1 %v1045_v23  ;;  %930 = vmatprep.subr.bf16.mxu0 %v1046_v24  ;;  %v1084_v10 = vld [vmem:[%s1411_s1 + $0x138] sm:$0xff]   ;;  %v46_v16 = vpack.c.bf16 %v38_v13, %v30_v12  ;;  %v29_v18 = vld [vmem:[%s1410_s0 + $0x20] sm:$0xff]  ;;  %v31_v20 = vld [vmem:[%s1410_s0 + $0x30] sm:$0xff] }
  0x1a   :  { %952 = vmatprep.subr.bf16.mxu1 %v1047_v25  ;;  %v1085_v11 = vld [vmem:[%s1411_s1 + $0x1b8] sm:$0xff]   ;;  %v37_v19 = vld [vmem:[%s1410_s0 + $0x60] sm:$0xff]  ;;  %v39_v22 = vld [vmem:[%s1410_s0 + $0x70] sm:$0xff] }
  0x1b   :  { %v32_v14 = vld [vmem:[%s1410_s0 + $0x38] sm:$0xff]  ;;  %v45_v21 = vpack.c.bf16 %v37_v19, %v29_v18  ;;  %v47_v23 = vpack.c.bf16 %v39_v22, %v31_v20 }
  0x1c   :  { %931 = vmatpush3.bf16.msra.mxu0 %v1048_v26  ;;  %v40_v15 = vld [vmem:[%s1410_s0 + $0x78] sm:$0xff] }
  0x1d   :  { %953 = vmatpush3.bf16.msra.mxu1 %v1049_v27  ;;  %932 = vmatprep.subr.bf16.mxu0 %v1050_v28  ;;  %v48_v17 = vpack.c.bf16 %v40_v15, %v32_v14 }
  0x1e   :  { %954 = vmatprep.subr.bf16.mxu1 %v1051_v29 }
  0x20   :  { %933 = vmatpush3.bf16.msra.mxu0 %v1052_v30 }
  0x21   :  { %955 = vmatpush3.bf16.msra.mxu1 %v1053_v31  ;;  %962 = vmatprep.subr.bf16.mxu0 %v1054_v44 }
  0x22   :  { %984 = vmatprep.subr.bf16.mxu1 %v1055_v45 }
  0x23   :  { %594 = vmatmul.mubr.bf16.vlgmr.msra.gmra.mrb[0].mxu0 %v41_v40 }
  0x24   :  { %635 = vmatmul.mubr.bf16.vlgmr.msra.gmra.mrb[0].mxu1 %v43_v43  ;;  %963 = vmatpush3.bf16.msra.mxu0 %v1056_v46 }
  0x25   :  { %985 = vmatpush3.bf16.msra.mxu1 %v1057_v47  ;;  %964 = vmatprep.subr.bf16.mxu0 %v1058_v48 }
  0x26   :  { %986 = vmatprep.subr.bf16.mxu1 %v1059_v49  ;;  %675 = vmatprep.mubr.bf16.mxu0 %v46_v16 }
  0x27   :  { %716 = vmatprep.mubr.bf16.mxu1 %v48_v17 }
  0x28   :  { %965 = vmatpush3.bf16.msra.mxu0 %v1060_v50 }
  0x29   :  { %987 = vmatpush3.bf16.msra.mxu1 %v1061_v51  ;;  %966 = vmatprep.subr.bf16.mxu0 %v1062_v52 }
  0x2a   :  { %988 = vmatprep.subr.bf16.mxu1 %v1063_v53 }
  0x2c   :  { %967 = vmatpush3.bf16.msra.mxu0 %v1064_v54 }
  0x2d   :  { %989 = vmatpush3.bf16.msra.mxu1 %v1065_v55  ;;  %968 = vmatprep.subr.bf16.mxu0 %v1066_v56 }
  0x2e   :  { %990 = vmatprep.subr.bf16.mxu1 %v1067_v57 }
  0x30   :  { %969 = vmatpush3.bf16.msra.mxu0 %v1068_v58 }
  0x31   :  { %991 = vmatpush3.bf16.msra.mxu1 %v1069_v59  ;;  %970 = vmatprep.subr.bf16.mxu0 %v1070_v60 }
  0x32   :  { %992 = vmatprep.subr.bf16.mxu1 %v1071_v61 }
  0x34   :  { %971 = vmatpush3.bf16.msra.mxu0 %v1072_v62 }
  0x35   :  { %993 = vmatpush3.bf16.msra.mxu1 %v1073_v63  ;;  %972 = vmatprep.subr.bf16.mxu0 %v1074_v0 }
  0x36   :  { %994 = vmatprep.subr.bf16.mxu1 %v1075_v1 }
  0x38   :  { %973 = vmatpush3.bf16.msra.mxu0 %v1076_v2 }
  0x39   :  { %995 = vmatpush3.bf16.msra.mxu1 %v1077_v3  ;;  %974 = vmatprep.subr.bf16.mxu0 %v1078_v4 }
  0x3a   :  { %996 = vmatprep.subr.bf16.mxu1 %v1079_v5 }
  0x3c   :  { %975 = vmatpush3.bf16.msra.mxu0 %v1080_v6 }
  0x3d   :  { %997 = vmatpush3.bf16.msra.mxu1 %v1081_v7  ;;  %976 = vmatprep.subr.bf16.mxu0 %v1082_v8 }
  0x3e   :  { %998 = vmatprep.subr.bf16.mxu1 %v1083_v9 }
  0x40   :  { %977 = vmatpush3.bf16.msra.mxu0 %v1084_v10 }
  0x41   :  { %999 = vmatpush3.bf16.msra.mxu1 %v1085_v11 }
  0x42   :  { %8 = vsyncpa [#allocation4], 0  ;;  %vm20_vm0 = vcmask 261120   ;;  %v1120_v24 = vmov 0.0   ;;  %v1086_v25 = vld [vmem:[%s1412_s2] sm:$0xff]   ;;  %vm1121_vm1 = vmmov 0   ;;  %v826_v20 = vlaneseq }
  0x43   :  { %676 = vmatmul.mubr.bf16.vlgmr.msra.gmra.mrb[4].mxu0 %v45_v21  ;;  %21 = vst.msk [vmem:[#allocation2] sm:$0xff] %vm20_vm0, %v1120_v24  ;;  %22 = vst.msk [vmem:[#allocation2 + $0x8] sm:$0xff] %vm20_vm0, %v1120_v24  ;;  %1009 = vmatprep.subr.bf16.mxu0 %v1120_v24  ;;  %v1087_v26 = vld [vmem:[%s1412_s2 + $0x8] sm:$0xff]   ;;  %s1122_s2 = smov [#allocation3]  }
  0x44   :  { %717 = vmatmul.mubr.bf16.vlgmr.msra.gmra.mrb[4].mxu1 %v47_v23  ;;  %1013 = vmatprep.mubr.msk.bf16.mxu0 %vm1121_vm1, %v1120_v24  ;;  %v827_v21 = vand.u32 127, %v826_v20  ;;  %s840_s12 = sshll.u32 %s1122_s2, 4  ;;  %s841_s12 = int_to_ptr.vmem [resolvable:$true] %s840_s12 }
  0x45   :  { %1010 = vmatpush3.bf16.msra.mxu0 %v1086_v25  ;;  %s1096_s13 = scalar_lea.vmem %s841_s12, 256  ;;  %p1101_p1 = scmp.lt.s32.totalorder %s841_s12, %s841_s12 }
  0x46   :  { %1011 = vmatprep.subr.bf16.mxu0 %v1120_v24  ;;  %vm828_vm6 = vcmp.lt.s32.totalorder %v827_v21, 8  ;;  %p1097_p0 = scmp.ne.s32.totalorder %s841_s12, %s1096_s13  ;;  %p1102_p2 = scmp.lt.s32.totalorder %s1096_s13, %s1096_s13 }
  0x48   :  { %p1103_p3 = por %p1102_p2, %p1101_p1 }
  0x49   :  { %1012 = vmatpush3.bf16.msra.mxu0 %v1087_v26 }
  0x4a   :  { %v23_v53 = vld [vmem:[#allocation2] sm:$0xff]  ;;  %v24_v57 = vld [vmem:[#allocation2 + $0x8] sm:$0xff]  ;;  %p1104_p4 = pnand %p1103_p3, %p1097_p0 }
  0xf6   :  { %v934_v27 = vpop.f32.mrb[0].mxu0 }
  0xf7   :  { %v956_v28 = vpop.f32.mrb[0].mxu1  ;;  %v935_v29 = vpop.f32.mrb[1].mxu0 }
  0xf8   :  { %v936_v30 = vadd.f32 %v935_v29, %v934_v27  ;;  %v957_v31 = vpop.f32.mrb[1].mxu1  ;;  %v937_v32 = vpop.f32.mrb[2].mxu0 }
  0xf9   :  { %v958_v33 = vadd.f32 %v957_v31, %v956_v28  ;;  %v959_v34 = vpop.f32.mrb[2].mxu1  ;;  %v938_v35 = vpop.f32.mrb[3].mxu0 }
  0xfa   :  { %v939_v36 = vadd.f32 %v938_v35, %v937_v32  ;;  %v960_v37 = vpop.f32.mrb[3].mxu1 }
  0xfb   :  { %v637_v38 = vadd.f32 %v958_v33, %v936_v30  ;;  %v961_v39 = vadd.f32 %v960_v37, %v959_v34 }
  0xfd   :  { %v640_v40 = vadd.f32 %v961_v39, %v939_v36 }
 0x116   :  { %v978_v41 = vpop.f32.mrb[4].mxu0 }
 0x117   :  { %v1000_v42 = vpop.f32.mrb[4].mxu1  ;;  %v979_v43 = vpop.f32.mrb[5].mxu0 }
 0x118   :  { %v980_v44 = vadd.f32 %v979_v43, %v978_v41  ;;  %v1001_v45 = vpop.f32.mrb[5].mxu1  ;;  %v981_v46 = vpop.f32.mrb[6].mxu0 }
 0x119   :  { %v1002_v47 = vadd.f32 %v1001_v45, %v1000_v42  ;;  %v1003_v48 = vpop.f32.mrb[6].mxu1  ;;  %v982_v49 = vpop.f32.mrb[7].mxu0 }
 0x11a   :  { %v678_v50 = vadd.f32 %v980_v44, %v637_v38  ;;  %v983_v51 = vadd.f32 %v982_v49, %v981_v46  ;;  %v1004_v52 = vpop.f32.mrb[7].mxu1 }
 0x11b   :  { %v1005_v54 = vadd.f32 %v1004_v52, %v1003_v48 }
 0x11c   :  { %v719_v55 = vadd.f32 %v1002_v47, %v678_v50  ;;  %v681_v56 = vadd.f32 %v983_v51, %v640_v40 }
 0x11e   :  { %v725_v58 = vadd.f32 %v719_v55, %v23_v53  ;;  %v722_v59 = vadd.f32 %v1005_v54, %v681_v56 }
 0x120   :  { %728 = vst.msk [vmem:[#allocation2] sm:$0xff] %vm20_vm0, %v725_v58  ;;  %v726_v60 = vadd.f32 %v722_v59, %v24_v57 }
 0x122   :  { %729 = vst.msk [vmem:[#allocation2 + $0x8] sm:$0xff] %vm20_vm0, %v726_v60 }
 0x127   :  { %v733_v61 = vld [vmem:[#allocation2] sm:$0xff] }
 0x128   :  { %v735_v62 = vmax.f32 %v733_v61, 0.0 }
 0x129   :  { %v734_v63 = vld [vmem:[#allocation2 + $0x8] sm:$0xff] }
 0x12a   :  { %v736_v0 = vmax.f32 %v734_v63, 0.0  ;;  %v798_v1 = vmul.f32 %v735_v62, %v735_v62 }
 0x12c   :  { %v800_v2 = vsel %vm20_vm0, %v798_v1, 0.0  ;;  %v737_v3 = vpack.c.bf16 %v736_v0, %v735_v62  ;;  %v799_v4 = vmul.f32 %v736_v0, %v736_v0 }
 0x12d   :  { %801 = vadd.xlane.f32.xlu0 %v800_v2 }
 0x12e   :  { %1014 = vmatmul.mubr.msk.bf16.vlgmr.msra.gmra.mrb[8].mxu0 %vm20_vm0, %v737_v3  ;;  %v803_v5 = vsel %vm20_vm0, %v799_v4, 0.0 }
 0x131   :  { %804 = vadd.xlane.f32.xlu0 %v803_v5 }
 0x1ba   :  { %v802_v6 = vpop.xlane.xlu0 %801 }
 0x1bb   :  { %1088 = vrsqrt.f32 %v802_v6  ;;  %vm808_vm2 = vcmp.eq.f32.partialorder %v802_v6, inf  ;;  %v811_v13 = vand.u32 2147483648, %v802_v6  ;;  %vm810_vm4 = vcmp.eq.f32.partialorder %v802_v6, 0.0 }
 0x1be   :  { %v805_v7 = vpop.xlane.xlu0 %804 }
 0x1bf   :  { %1090 = vrsqrt.f32 %v805_v7  ;;  %vm815_vm3 = vcmp.eq.f32.partialorder %v805_v7, inf  ;;  %v818_v15 = vand.u32 2147483648, %v805_v7  ;;  %vm817_vm5 = vcmp.eq.f32.partialorder %v805_v7, 0.0 }
 0x1c5   :  { %v1089_v8 = vpop.eup %1088 }
 0x1c6   :  { %v807_v10 = vmul.f32 %v1089_v8, %v802_v6 }
 0x1c8   :  { %v809_v12 = vsel %vm808_vm2, %v802_v6, %v807_v10 }
 0x1c9   :  { %v1091_v9 = vpop.eup %1090  ;;  %v812_v16 = vsel %vm810_vm4, %v811_v13, %v809_v12 }
 0x1ca   :  { %v814_v11 = vmul.f32 %v1091_v9, %v805_v7  ;;  %v820_v18 = vadd.f32 0.0001, %v812_v16 }
 0x1cc   :  { %v816_v14 = vsel %vm815_vm3, %v805_v7, %v814_v11  ;;  %1092 = vrcp.f32 %v820_v18 }
 0x1cd   :  { %v819_v17 = vsel %vm817_vm5, %v818_v15, %v816_v14 }
 0x1ce   :  { %v821_v19 = vadd.f32 0.0001, %v819_v17 }
 0x1d0   :  { %1094 = vrcp.f32 %v821_v19 }
 0x1d6   :  { %v1093_v22 = vpop.eup %1092 }
 0x1d7   :  { %v829_v25 = vsel %vm828_vm6, %v1093_v22, 1.0 }
 0x1da   :  { %v1095_v23 = vpop.eup %1094 }
 0x1db   :  { %v830_v29 = vsel %vm828_vm6, %v1095_v23, 1.0 }
 0x201   :  { %v791_v24 = vpop.f32.mrb[8].mxu0 }
 0x202   :  { %v831_v26 = vmul.f32 %v829_v25, %v791_v24  ;;  %v1015_v27 = vpop.f32.mrb[9].mxu0 }
 0x203   :  { %v794_v28 = vpop.f32.mrb[10].mxu0 }
 0x204   :  { %833 = vst [vmem:[#allocation3] sm:$0xff] %v831_v26  ;;  %v832_v30 = vmul.f32 %v830_v29, %v794_v28  ;;  %v1016_v31 = vpop.f32.mrb[11].mxu0 }
 0x206   :  { %834 = vst [vmem:[#allocation3 + $0x8] sm:$0xff] %v832_v30 }
 0x207   :  { %1107 = shalt.err (!%p1104_p4)
}
 0x208   :  { %s1108_s16 = scalar_lea.hbm %s1413_s3, 256 }
 0x209   :  { %p1109_p5 = scmp.ne.s32.totalorder %s1413_s3, %s1108_s16  ;;  %p1112_p6 = scmp.lt.u32.totalorder %s1108_s16, %s1413_s3 }
 0x20b   :  { %p1114_p7 = pnand %p1112_p6, %p1109_p5 }
 0x20d   :  { %1117 = shalt.err (!%p1114_p7)
}
 0x20e   :  { %s1123_s21 = smov 128   ;;  %s1124_s22 = smov 8  }
 0x20f   :  { %846 = dma.vmem_to_hbm [thread:$0]  %s841_s12, 256, %s1413_s3, [#allocation4], %s1123_s21, %s1123_s21, %s1124_s22  }
 0x210   :  { %1118 = dma.done.wait [#allocation4], 256  }
 0x211   :  { %1119 = vsyncadd [#allocation4], 4294967040 }
 0x212   :  { %850 = vsyncpa [#allocation4], 1 }

</bundles_post_ra>
